<compile_context>
chip_gen: v7x
topology: tpu7x:2x2x1
jax: 0.10.0
libtpu: 0.0.40
codegen_flags: <defaults>
</compile_context>

<pallas_src>
import functools

import jax
import jax.numpy as jnp
from jax.experimental import pallas as pl
from jax.experimental.pallas import tpu as pltpu

_LANES = 128
_SUBLANES = 8
_MAX_BLOCK_ROWS = 8192  # (8192, 128) f32 tile = 4 MiB per input per buffer


def _round_up(x: int, m: int) -> int:
    return ((x + m - 1) // m) * m


def _bce_dice_sums_kernel(x_ref, t_ref, out_ref, *, block_rows: int, bpc: int,
                          total_rows: int, needs_mask: bool):
    """One grid step: fold one (block_rows, 128) tile of logits/targets into
    the per-core (1, 3, 8, 128) partial-sum slab (bce, intersection, union)."""
    c = pl.program_id(0)  # "core" (parallel) axis
    b = pl.program_id(1)  # reduction (arbitrary) axis

    @pl.when(b == 0)
    def _init():
        out_ref[...] = jnp.zeros_like(out_ref)

    z = x_ref[...].astype(jnp.float32)
    t = t_ref[...].astype(jnp.float32)

    if needs_mask:
        # Mask whole rows past the true row count (partial tail block and the
        # duplicated clamped block when num_blocks is odd).  Masked logits are
        # set to -100 so bce / sigmoid / union contributions are exactly 0 —
        # no per-result selects needed.
        lb = c * bpc + b  # logical (un-clamped) block index
        row = jax.lax.broadcasted_iota(jnp.int32, (block_rows, _LANES), 0)
        valid = (lb * block_rows + row) < total_rows
        z = jnp.where(valid, z, -100.0)
        t = jnp.where(valid, t, 0.0)

    # Shared exp(-|z|):
    #   sigmoid(z) = where(z >= 0, 1, e) / (1 + e)
    #   bce        = max(z, 0) - z*t + log(1 + e)         (stable BCE-with-logits)
    e = jnp.exp(-jnp.abs(z))
    p = jnp.where(z >= 0.0, 1.0, e) / (1.0 + e)
    bce = jnp.maximum(z, 0.0) - z * t + jnp.log(1.0 + e)
    inter = p * t
    union = p + t

    def _fold(v):  # (block_rows, 128) -> (8, 128) partial sums (VPU add chain)
        return v.reshape(block_rows // _SUBLANES, _SUBLANES, _LANES).sum(axis=0)

    out_ref[0, 0] += _fold(bce)
    out_ref[0, 1] += _fold(inter)
    out_ref[0, 2] += _fold(union)


def _bce_dice_sums(logits_flat: jax.Array, targets_flat: jax.Array,
                   max_block_rows: int):
    """Returns (sum_bce, sum(p*t), sum(p) + sum(t)) over the flattened inputs."""
    n = logits_flat.shape[0]

    # Lane reshape needs a multiple of 128; pad at most 127 elements with
    # values that contribute exactly zero to every accumulated sum.
    rem = n % _LANES
    if rem:
        pad = _LANES - rem
        logits_flat = jnp.pad(logits_flat, (0, pad), constant_values=-100.0)
        targets_flat = jnp.pad(targets_flat, (0, pad), constant_values=0.0)

    rows = logits_flat.shape[0] // _LANES
    x2 = logits_flat.reshape(rows, _LANES)
    t2 = targets_flat.reshape(rows, _LANES)

    block_rows = min(_round_up(max_block_rows, _SUBLANES),
                     _round_up(rows, _SUBLANES))
    num_blocks = pl.cdiv(rows, block_rows)
    num_cores = 2 if num_blocks >= 2 else 1   # sharded across TCs on v7x
    bpc = pl.cdiv(num_blocks, num_cores)      # blocks per core

    needs_clamp = (num_cores * bpc) != num_blocks
    needs_mask = (rows % block_rows != 0) or needs_clamp

    if needs_clamp:
        def in_map(c, b):
            return (jnp.minimum(c * bpc + b, num_blocks - 1), 0)
    else:
        def in_map(c, b):
            return (c * bpc + b, 0)

    kernel = functools.partial(
        _bce_dice_sums_kernel, block_rows=block_rows, bpc=bpc,
        total_rows=rows, needs_mask=needs_mask)

    itemsize = x2.dtype.itemsize + t2.dtype.itemsize
    partials = pl.pallas_call(
        kernel,
        out_shape=jax.ShapeDtypeStruct((num_cores, 3, _SUBLANES, _LANES),
                                       jnp.float32),
        grid_spec=pltpu.PrefetchScalarGridSpec(
            num_scalar_prefetch=0,
            grid=(num_cores, bpc),
            in_specs=[
                pl.BlockSpec((block_rows, _LANES), in_map),
                pl.BlockSpec((block_rows, _LANES), in_map),
            ],
            out_specs=pl.BlockSpec((1, 3, _SUBLANES, _LANES),
                                   lambda c, b: (c, 0, 0, 0)),
        ),
        compiler_params=pltpu.CompilerParams(
            dimension_semantics=("parallel", "arbitrary"),
            vmem_limit_bytes=32 * 1024 * 1024,
        ),
        cost_estimate=pl.CostEstimate(
            flops=15 * n,
            transcendentals=3 * n,
            bytes_accessed=itemsize * n + num_cores * 3 * _SUBLANES * _LANES * 4,
        ),
    )(x2, t2)

    sums = jnp.sum(partials, axis=(0, 2, 3))  # tiny (<=6144-elem) XLA reduce
    return sums[0], sums[1], sums[2]


@functools.partial(jax.jit, static_argnames=("smooth", "max_block_rows"))
def bce_dice_loss(logits: jax.Array, targets: jax.Array, smooth: float = 1e-6,
                  *, max_block_rows: int = _MAX_BLOCK_ROWS) -> jax.Array:
    """Matches PyTorch BCEDiceLoss.forward:
         BCEWithLogits(logits, targets).mean() + 2 * DiceLoss(sigmoid(logits), targets)
    """
    z_flat = logits.reshape(-1)
    t_flat = targets.reshape(-1)
    n = z_flat.shape[0]

    bce_sum, intersection, union = _bce_dice_sums(z_flat, t_flat, max_block_rows)
    bce = bce_sum / n
    dice = 1.0 - (2.0 * intersection + smooth) / (union + smooth)
    return bce + 2.0 * dice


def _bce_dice_loss_ref(logits, targets, smooth=1e-6):
    z = logits.reshape(-1).astype(jnp.float32)
    t = targets.reshape(-1).astype(jnp.float32)
    bce = jnp.mean(jnp.maximum(z, 0.0) - z * t
                   + jnp.log(1.0 + jnp.exp(-jnp.abs(z))))
    p = jax.nn.sigmoid(z)
    inter = jnp.sum(p * t)
    union = jnp.sum(p) + jnp.sum(t)
    dice = 1.0 - (2.0 * inter + smooth) / (union + smooth)
    return bce + 2.0 * dice


if __name__ == "__main__":
    key = jax.random.PRNGKey(0)
    ks = jax.random.split(key, 6)

    # 1) Lane-aligned NCHW logits / binary masks (2*4*16*16 = 2048 elements).
    logits = jax.random.normal(ks[0], (2, 4, 16, 16), dtype=jnp.float32)
    target = (jax.random.uniform(ks[1], (2, 4, 16, 16)) > 0.5).astype(jnp.float32)
    loss = bce_dice_loss(logits, target, smooth=1e-6)
    jax.block_until_ready(loss)
    ref = _bce_dice_loss_ref(logits, target, smooth=1e-6)
    assert jnp.allclose(loss, ref, atol=1e-4, rtol=1e-5), (loss, ref)

    # 2) Ragged case (1155 elements): exercises the lane-pad + row-mask path.
    logits2 = jax.random.normal(ks[2], (3, 5, 7, 11), dtype=jnp.float32)
    target2 = (jax.random.uniform(ks[3], (3, 5, 7, 11)) > 0.5).astype(jnp.float32)
    loss2 = bce_dice_loss(logits2, target2, smooth=1e-6)
    jax.block_until_ready(loss2)
    ref2 = _bce_dice_loss_ref(logits2, target2, smooth=1e-6)
    assert jnp.allclose(loss2, ref2, atol=1e-4, rtol=1e-5), (loss2, ref2)

    # 3) Multi-block, odd block count (small max_block_rows so the test stays
    #    tiny): exercises the 2-way core split, block-index clamping and the
    #    partial tail block masking.
    logits3 = jax.random.normal(ks[4], (2, 4, 16, 21), dtype=jnp.float32)
    target3 = (jax.random.uniform(ks[5], (2, 4, 16, 21)) > 0.5).astype(jnp.float32)
    loss3 = bce_dice_loss(logits3, target3, smooth=1e-6, max_block_rows=8)
    jax.block_until_ready(loss3)
    ref3 = _bce_dice_loss_ref(logits3, target3, smooth=1e-6)
    assert jnp.allclose(loss3, ref3, atol=1e-4, rtol=1e-5), (loss3, ref3)

    print("KERNEL_OK")
</pallas_src>

<mosaic_0001>
module attributes {stable_mosaic.version = 11 : i64} {
  func.func @_bce_dice_sums_kernel(%arg0: i32, %arg1: i32, %arg2: memref<16x128xf32, #tpu.memory_space<vmem>>, %arg3: memref<16x128xf32, #tpu.memory_space<vmem>>, %arg4: memref<1x3x8x128xf32, #tpu.memory_space<vmem>>) attributes {dimension_semantics = [#tpu.dimension_semantics<parallel>, #tpu.dimension_semantics<arbitrary>], iteration_bounds = array<i64: 1, 1>, scalar_prefetch = 0 : i64, scratch_operands = 0 : i64, tpu.core_type = #tpu.core_type<tc>, window_params = [{transform_indices = @transform_0, window_bounds = array<i64: 16, 128>}, {transform_indices = @transform_1, window_bounds = array<i64: 16, 128>}, {transform_indices = @transform_2, window_bounds = array<i64: 1, 3, 8, 128>}]} {
    %c0_i32 = arith.constant 0 : i32
    %0 = arith.cmpi eq, %arg1, %c0_i32 : i32
    %1 = arith.extui %0 : i1 to i32
    %c0_i32_0 = arith.constant 0 : i32
    %2 = arith.cmpi ne, %1, %c0_i32_0 : i32
    scf.if %2 {
      %cst_34 = arith.constant 0.000000e+00 : f32
      %50 = vector.broadcast %cst_34 : f32 to vector<1x3x8x128xf32>
      %c0_35 = arith.constant 0 : index
      %c0_36 = arith.constant 0 : index
      %c0_37 = arith.constant 0 : index
      %c0_38 = arith.constant 0 : index
      %51 = vector.load %arg4[%c0_35, %c0_36, %c0_37, %c0_38] : memref<1x3x8x128xf32, #tpu.memory_space<vmem>>, vector<1x3x8x128xf32>
      tpu.vector_store %arg4[%c0_35, %c0_36, %c0_37, %c0_38], %50 {strides = array<i32>} : memref<1x3x8x128xf32, #tpu.memory_space<vmem>>, vector<1x3x8x128xf32>,
    } else {
    }
    %c0 = arith.constant 0 : index
    %c0_1 = arith.constant 0 : index
    %3 = vector.load %arg2[%c0, %c0_1] : memref<16x128xf32, #tpu.memory_space<vmem>>, vector<16x128xf32>
    %c0_2 = arith.constant 0 : index
    %c0_3 = arith.constant 0 : index
    %4 = vector.load %arg3[%c0_2, %c0_3] : memref<16x128xf32, #tpu.memory_space<vmem>>, vector<16x128xf32>
    %5 = math.absf %3 : vector<16x128xf32>
    %cst = arith.constant 0.000000e+00 : f32
    %6 = vector.broadcast %cst : f32 to vector<16x128xf32>
    %7 = arith.subf %6, %5 : vector<16x128xf32>
    %8 = math.exp %7 : vector<16x128xf32>
    %cst_4 = arith.constant 0.000000e+00 : f32
    %9 = vector.broadcast %cst_4 : f32 to vector<16x128xf32>
    %10 = arith.cmpf oge, %3, %9 : vector<16x128xf32>
    %cst_5 = arith.constant 1.000000e+00 : f32
    %11 = vector.broadcast %cst_5 : f32 to vector<16x128xf32>
    %12 = arith.select %10, %11, %8 : vector<16x128xi1>, vector<16x128xf32>
    %cst_6 = arith.constant 1.000000e+00 : f32
    %13 = vector.broadcast %cst_6 : f32 to vector<16x128xf32>
    %14 = arith.addf %13, %8 : vector<16x128xf32>
    %15 = arith.divf %12, %14 : vector<16x128xf32>
    %cst_7 = arith.constant 0.000000e+00 : f32
    %16 = vector.broadcast %cst_7 : f32 to vector<16x128xf32>
    %17 = arith.maximumf %3, %16 : vector<16x128xf32>
    %18 = arith.mulf %3, %4 : vector<16x128xf32>
    %19 = arith.subf %17, %18 : vector<16x128xf32>
    %cst_8 = arith.constant 1.000000e+00 : f32
    %20 = vector.broadcast %cst_8 : f32 to vector<16x128xf32>
    %21 = arith.addf %20, %8 : vector<16x128xf32>
    %22 = math.log %21 : vector<16x128xf32>
    %23 = arith.addf %19, %22 : vector<16x128xf32>
    %24 = arith.mulf %15, %4 : vector<16x128xf32>
    %25 = arith.addf %15, %4 : vector<16x128xf32>
    %c0_9 = arith.constant 0 : index
    %c0_10 = arith.constant 0 : index
    %c0_11 = arith.constant 0 : index
    %c0_12 = arith.constant 0 : index
    %26 = vector.load %arg4[%c0_9, %c0_10, %c0_11, %c0_12] : memref<1x3x8x128xf32, #tpu.memory_space<vmem>>, vector<1x1x8x128xf32>
    %27 = vector.shape_cast %26 : vector<1x1x8x128xf32> to vector<8x128xf32>
    %28 = vector.shape_cast %23 : vector<16x128xf32> to vector<2x8x128xf32>
    %cst_13 = arith.constant dense<0.000000e+00> : vector<8x128xf32>
    %29 = vector.multi_reduction <add>, %28, %cst_13 [0] : vector<2x8x128xf32> to vector<8x128xf32>
    %30 = arith.addf %27, %29 : vector<8x128xf32>
    %c0_14 = arith.constant 0 : index
    %c0_15 = arith.constant 0 : index
    %c0_16 = arith.constant 0 : index
    %c0_17 = arith.constant 0 : index
    %31 = vector.load %arg4[%c0_14, %c0_15, %c0_16, %c0_17] : memref<1x3x8x128xf32, #tpu.memory_space<vmem>>, vector<1x1x8x128xf32>
    %32 = vector.shape_cast %31 : vector<1x1x8x128xf32> to vector<8x128xf32>
    %33 = vector.shape_cast %30 : vector<8x128xf32> to vector<1x1x8x128xf32>
    tpu.vector_store %arg4[%c0_14, %c0_15, %c0_16, %c0_17], %33 {strides = array<i32>} : memref<1x3x8x128xf32, #tpu.memory_space<vmem>>, vector<1x1x8x128xf32>,
    %c0_18 = arith.constant 0 : index
    %c1 = arith.constant 1 : index
    %c0_19 = arith.constant 0 : index
    %c0_20 = arith.constant 0 : index
    %34 = vector.load %arg4[%c0_18, %c1, %c0_19, %c0_20] : memref<1x3x8x128xf32, #tpu.memory_space<vmem>>, vector<1x1x8x128xf32>
    %35 = vector.shape_cast %34 : vector<1x1x8x128xf32> to vector<8x128xf32>
    %36 = vector.shape_cast %24 : vector<16x128xf32> to vector<2x8x128xf32>
    %cst_21 = arith.constant dense<0.000000e+00> : vector<8x128xf32>
    %37 = vector.multi_reduction <add>, %36, %cst_21 [0] : vector<2x8x128xf32> to vector<8x128xf32>
    %38 = arith.addf %35, %37 : vector<8x128xf32>
    %c0_22 = arith.constant 0 : index
    %c1_23 = arith.constant 1 : index
    %c0_24 = arith.constant 0 : index
    %c0_25 = arith.constant 0 : index
    %39 = vector.load %arg4[%c0_22, %c1_23, %c0_24, %c0_25] : memref<1x3x8x128xf32, #tpu.memory_space<vmem>>, vector<1x1x8x128xf32>
    %40 = vector.shape_cast %39 : vector<1x1x8x128xf32> to vector<8x128xf32>
    %41 = vector.shape_cast %38 : vector<8x128xf32> to vector<1x1x8x128xf32>
    tpu.vector_store %arg4[%c0_22, %c1_23, %c0_24, %c0_25], %41 {strides = array<i32>} : memref<1x3x8x128xf32, #tpu.memory_space<vmem>>, vector<1x1x8x128xf32>,
    %c0_26 = arith.constant 0 : index
    %c2 = arith.constant 2 : index
    %c0_27 = arith.constant 0 : index
    %c0_28 = arith.constant 0 : index
    %42 = vector.load %arg4[%c0_26, %c2, %c0_27, %c0_28] : memref<1x3x8x128xf32, #tpu.memory_space<vmem>>, vector<1x1x8x128xf32>
    %43 = vector.shape_cast %42 : vector<1x1x8x128xf32> to vector<8x128xf32>
    %44 = vector.shape_cast %25 : vector<16x128xf32> to vector<2x8x128xf32>
    %cst_29 = arith.constant dense<0.000000e+00> : vector<8x128xf32>
    %45 = vector.multi_reduction <add>, %44, %cst_29 [0] : vector<2x8x128xf32> to vector<8x128xf32>
    %46 = arith.addf %43, %45 : vector<8x128xf32>
    %c0_30 = arith.constant 0 : index
    %c2_31 = arith.constant 2 : index
    %c0_32 = arith.constant 0 : index
    %c0_33 = arith.constant 0 : index
    %47 = vector.load %arg4[%c0_30, %c2_31, %c0_32, %c0_33] : memref<1x3x8x128xf32, #tpu.memory_space<vmem>>, vector<1x1x8x128xf32>
    %48 = vector.shape_cast %47 : vector<1x1x8x128xf32> to vector<8x128xf32>
    %49 = vector.shape_cast %46 : vector<8x128xf32> to vector<1x1x8x128xf32>
    tpu.vector_store %arg4[%c0_30, %c2_31, %c0_32, %c0_33], %49 {strides = array<i32>} : memref<1x3x8x128xf32, #tpu.memory_space<vmem>>, vector<1x1x8x128xf32>,
    return
  }
  func.func @transform_0(%arg0: i32, %arg1: i32) -> (i32, i32) {
    %c1_i32 = arith.constant 1 : i32
    %0 = arith.muli %arg0, %c1_i32 : i32
    %1 = arith.addi %0, %arg1 : i32
    %c0_i32 = arith.constant 0 : i32
    %c0_i32_0 = arith.constant 0 : i32
    return %1, %c0_i32 : i32, i32
  }
  func.func @transform_1(%arg0: i32, %arg1: i32) -> (i32, i32) {
    %c1_i32 = arith.constant 1 : i32
    %0 = arith.muli %arg0, %c1_i32 : i32
    %1 = arith.addi %0, %arg1 : i32
    %c0_i32 = arith.constant 0 : i32
    %c0_i32_0 = arith.constant 0 : i32
    return %1, %c0_i32 : i32, i32
  }
  func.func @transform_2(%arg0: i32, %arg1: i32) -> (i32, i32, i32, i32) {
    %c0_i32 = arith.constant 0 : i32
    %c0_i32_0 = arith.constant 0 : i32
    %c0_i32_1 = arith.constant 0 : i32
    %c0_i32_2 = arith.constant 0 : i32
    return %arg0, %c0_i32, %c0_i32_0, %c0_i32_1 : i32, i32, i32, i32
  }
}

</mosaic_0001>

<bundles_post_ra>
// kernel: bce_dice_loss.1
= control target key start
LH: loop header
LB: loop body
LE: loop exit
PB: predicated region body
PF: predicated region fallthrough
CT: control target
= control target key end

     0   :  { %s183_s0 = inlined_call_operand.vmem [shape: f32[16,128], index: 0, kind: input, shape index: {}]   ;;  %s184_s1 = inlined_call_operand.vmem [shape: f32[16,128], index: 1, kind: input, shape index: {}]   ;;  %s185_s2 = inlined_call_operand.vmem [shape: f32[1,3,8,128], index: 2, kind: output, shape index: {}]  }
   0x1   :  { %v62_v0 = vld [vmem:[%s183_s0] sm:$0xff]  ;;  %v63_v1 = vld [vmem:[%s183_s0 + $0x8] sm:$0xff] }
   0x2   :  { %v66_v2 = vand.u32 2147483647, %v62_v0  ;;  %v67_v3 = vand.u32 2147483647, %v63_v1  ;;  %v64_v12 = vld [vmem:[%s184_s1] sm:$0xff]  ;;  %v65_v13 = vld [vmem:[%s184_s1 + $0x8] sm:$0xff] }
   0x3   :  { %vm74_vm0 = vcmp.ge.f32.partialorder %v62_v0, 0.0  ;;  %vm75_vm1 = vcmp.ge.f32.partialorder %v63_v1, 0.0  ;;  %v84_v14 = vmax.f32 %v62_v0, 0.0  ;;  %v86_v15 = vmul.f32 %v64_v12, %v62_v0 }
   0x4   :  { %v68_v4 = vsub.f32 0.0, %v66_v2  ;;  %v69_v5 = vsub.f32 0.0, %v67_v3  ;;  %v85_v16 = vmax.f32 %v63_v1, 0.0  ;;  %v87_v17 = vmul.f32 %v65_v13, %v63_v1 }
   0x5   :  { %v88_v22 = vsub.f32 %v84_v14, %v86_v15 }
   0x6   :  { %v70_v6 = vmul.f32 1.442695, %v68_v4  ;;  %v72_v7 = vmul.f32 1.442695, %v69_v5  ;;  %v89_v25 = vsub.f32 %v85_v16, %v87_v17 }
   0x8   :  { %135 = vpow2.f32 %v70_v6 }
   0x9   :  { %137 = vpow2.f32 %v72_v7 }
  0x12   :  { %v136_v8 = vpop.eup %135 }
  0x13   :  { %v138_v9 = vpop.eup %137  ;;  %v78_v10 = vadd.f32 1.0, %v136_v8  ;;  %v76_v18 = vsel %vm74_vm0, 1.0, %v136_v8 }
  0x14   :  { %v79_v11 = vadd.f32 1.0, %v138_v9  ;;  %v77_v19 = vsel %vm75_vm1, 1.0, %v138_v9 }
  0x15   :  { %139 = vrcp.f32 %v78_v10 }
  0x16   :  { %141 = vrcp.f32 %v79_v11 }
  0x17   :  { %143 = vlog2.f32 %v78_v10 }
  0x18   :  { %145 = vlog2.f32 %v79_v11 }
  0x1f   :  { %v140_v20 = vpop.eup %139 }
  0x20   :  { %v142_v21 = vpop.eup %141  ;;  %v81_v23 = vmul.f32 %v140_v20, %v76_v18 }
  0x21   :  { %v144_v24 = vpop.eup %143  ;;  %v83_v26 = vmul.f32 %v142_v21, %v77_v19 }
  0x22   :  { %v146_v27 = vpop.eup %145  ;;  %v91_v28 = vmul.f32 0.6931472, %v144_v24  ;;  %v96_v29 = vmul.f32 %v81_v23, %v64_v12  ;;  %v98_v30 = vadd.f32 %v81_v23, %v64_v12 }
  0x23   :  { %v93_v31 = vmul.f32 0.6931472, %v146_v27  ;;  %v97_v32 = vmul.f32 %v83_v26, %v65_v13  ;;  %v99_v33 = vadd.f32 %v83_v26, %v65_v13 }
  0x24   :  { %v94_v34 = vadd.f32 %v91_v28, %v88_v22 }
  0x25   :  { %v95_v35 = vadd.f32 %v93_v31, %v89_v25  ;;  %v106_v36 = vadd.f32 %v97_v32, %v96_v29  ;;  %v111_v37 = vadd.f32 %v99_v33, %v98_v30 }
  0x27   :  { %v101_v38 = vadd.f32 %v95_v35, %v94_v34  ;;  %131 = vst [vmem:[%s185_s2 + $0x8] sm:$0xff] %v106_v36  ;;  %133 = vst [vmem:[%s185_s2 + $0x10] sm:$0xff] %v111_v37 }
  0x29   :  { %103 = vst [vmem:[%s185_s2] sm:$0xff] %v101_v38 }

</bundles_post_ra>
